<compile_context>
chip_gen: v7x
topology: tpu7x:2x2x1
jax: 0.10.0
libtpu: 0.0.40
codegen_flags: <defaults>
</compile_context>

<pallas_src>
import jax
import jax.numpy as jnp
from jax.experimental import pallas as pl
from jax.experimental.pallas import tpu as pltpu

NUM_CLASSES = 11
LANE = 128
MAX_TILE_ROWS = 512          # 512 rows * 128 lanes = 65536 pixels per tile/class
                             # -> <7 MiB double-buffered f32, fits v5e's 16 MiB
                             #    default scoped VMEM and v7x's smaller VMEM.


def _iou_kernel(pred_ref, tgt_ref, out_ref, iand_acc, t_acc, p_acc):
    # pred_ref: (1, C, S, 128) in pred's native float dtype
    # tgt_ref:  (1, 1, S, 128) int32 labels
    # out_ref:  (1, 1, 128)    f32 per-batch loss (broadcast over lanes)
    # *_acc:    (C, 128)       f32 lane-wise accumulators (VMEM scratch)
    s = pl.program_id(1)

    @pl.when(s == 0)
    def _init():
        iand_acc[...] = jnp.zeros_like(iand_acc)
        t_acc[...] = jnp.zeros_like(t_acc)
        p_acc[...] = jnp.zeros_like(p_acc)

    pred = pred_ref[0].astype(jnp.float32)           # (C, S, 128)
    tgt = tgt_ref[0, 0]                              # (S, 128) int32
    C = pred.shape[0]

    # one-hot is never materialized: a boolean mask drives two selects.
    cls = jax.lax.broadcasted_iota(jnp.int32, pred.shape, 0)
    mask = cls == tgt[None, :, :]                    # (C, S, 128)

    # lane-wise partial sums (VALU); cross-lane reduce deferred to the epilogue
    iand_acc[...] += jnp.sum(jnp.where(mask, pred, 0.0), axis=1)   # (C, 128)
    t_acc[...] += jnp.sum(jnp.where(mask, 1.0, 0.0), axis=1)       # (C, 128)
    p_acc[...] += jnp.sum(pred, axis=1)                            # (C, 128)

    @pl.when(s == pl.num_programs(1) - 1)
    def _finalize():
        iand = jnp.sum(iand_acc[...], axis=1, keepdims=True)       # (C, 1)
        sum_t = jnp.sum(t_acc[...], axis=1, keepdims=True)
        sum_p = jnp.sum(p_acc[...], axis=1, keepdims=True)
        ior = sum_t + sum_p - iand
        # NOTE: direct division matches the PyTorch reference (no epsilon);
        # with softmax-style pred, sum_p > 0 so ior > 0 for every class.
        iou = iand / ior                                           # (C, 1)
        keep = jax.lax.broadcasted_iota(jnp.int32, iou.shape, 0) >= 1
        loss_b = 1.0 - jnp.sum(jnp.where(keep, iou, 0.0)) / jnp.float32(C - 1)
        out_ref[...] = jnp.full(out_ref.shape, loss_b, dtype=out_ref.dtype)


def iou_loss(pred, target):
    """pred: float [B, 11, H, W] (f32 or bf16); target: int labels [B, H, W]."""
    B, C, H, W = pred.shape
    assert C == NUM_CLASSES
    HW = H * W

    # stream pred in its native dtype (bf16 upstream -> half the HBM traffic);
    # the kernel casts to f32 internally.
    pred_f = pred.reshape(B, C, HW)
    tgt_i = target.astype(jnp.int32).reshape(B, 1, HW)
    # TODO(synk): labels could be narrowed to int8 to shave the target stream.

    n_rows = -(-HW // LANE)                    # spatial rows of 128 lanes
    if n_rows <= MAX_TILE_ROWS:
        s_tile = n_rows                        # whole image in one tile
    else:
        s_tile = MAX_TILE_ROWS                 # multiple of 8 -> valid block
        n_rows = -(-n_rows // s_tile) * s_tile
    hw_pad = n_rows * LANE
    if hw_pad != HW:
        # zero padding is exactly neutral: padded pred contributes 0 mass and
        # padded label 0 only touches the excluded background class.
        pad = hw_pad - HW
        pred_f = jnp.pad(pred_f, ((0, 0), (0, 0), (0, pad)))
        tgt_i = jnp.pad(tgt_i, ((0, 0), (0, 0), (0, pad)))

    pred_r = pred_f.reshape(B, C, n_rows, LANE)
    tgt_r = tgt_i.reshape(B, 1, n_rows, LANE)
    n_tiles = n_rows // s_tile

    per_batch = pl.pallas_call(
        _iou_kernel,
        out_shape=jax.ShapeDtypeStruct((B, 1, LANE), jnp.float32),
        grid_spec=pltpu.PrefetchScalarGridSpec(
            num_scalar_prefetch=0,
            grid=(B, n_tiles),
            in_specs=[
                pl.BlockSpec((1, C, s_tile, LANE), lambda b, s: (b, 0, s, 0)),
                pl.BlockSpec((1, 1, s_tile, LANE), lambda b, s: (b, 0, s, 0)),
            ],
            out_specs=pl.BlockSpec((1, 1, LANE), lambda b, s: (b, 0, 0)),
            scratch_shapes=[
                pltpu.VMEM((C, LANE), jnp.float32),   # intersection
                pltpu.VMEM((C, LANE), jnp.float32),   # target count
                pltpu.VMEM((C, LANE), jnp.float32),   # pred mass
            ],
        ),
        compiler_params=pltpu.CompilerParams(
            dimension_semantics=("parallel", "arbitrary")),
    )(pred_r, tgt_r)

    # glue: mean of per-batch losses (== mIoU / b in the PyTorch reference)
    return jnp.mean(per_batch[:, 0, 0])


if __name__ == "__main__":
    key = jax.random.PRNGKey(0)
    kp, kt = jax.random.split(key)
    B, C, H, W = 2, NUM_CLASSES, 16, 16
    # pred: soft class scores (e.g. post-softmax probabilities), positive
    pred = jax.nn.softmax(jax.random.normal(kp, (B, C, H, W), jnp.float32), axis=1)
    # target: integer class labels
    target = jax.random.randint(kt, (B, H, W), 0, C, dtype=jnp.int32)

    loss = iou_loss(pred, target)
    jax.block_until_ready(loss)

    # pure-JAX reference check of the same semantics
    onehot = jax.nn.one_hot(target, C, dtype=jnp.float32).transpose(0, 3, 1, 2)
    iand = jnp.sum(onehot * pred, axis=(2, 3))
    ior = jnp.sum(onehot, axis=(2, 3)) + jnp.sum(pred, axis=(2, 3)) - iand
    iou = (iand / ior)[:, 1:]
    ref = jnp.mean(1.0 - jnp.sum(iou, axis=1) / (C - 1))
    assert jnp.allclose(loss, ref, rtol=1e-5, atol=1e-5), (loss, ref)

    print("KERNEL_OK")
</pallas_src>

<mosaic_0001>
module attributes {stable_mosaic.version = 11 : i64} {
  func.func @_iou_kernel(%arg0: i32, %arg1: i32, %arg2: memref<1x11x2x128xf32, #tpu.memory_space<vmem>>, %arg3: memref<1x1x2x128xi32, #tpu.memory_space<vmem>>, %arg4: memref<1x1x128xf32, #tpu.memory_space<vmem>>, %arg5: memref<11x128xf32, #tpu.memory_space<vmem>>, %arg6: memref<11x128xf32, #tpu.memory_space<vmem>>, %arg7: memref<11x128xf32, #tpu.memory_space<vmem>>) attributes {dimension_semantics = [#tpu.dimension_semantics<parallel>, #tpu.dimension_semantics<arbitrary>], iteration_bounds = array<i64: 2, 1>, scalar_prefetch = 0 : i64, scratch_operands = 3 : i64, tpu.core_type = #tpu.core_type<tc>, window_params = [{transform_indices = @transform_0, window_bounds = array<i64: 1, 11, 2, 128>}, {transform_indices = @transform_1, window_bounds = array<i64: 1, 1, 2, 128>}, {transform_indices = @transform_2, window_bounds = array<i64: 1, 1, 128>}]} {
    %c0_i32 = arith.constant 0 : i32
    %0 = arith.cmpi eq, %arg1, %c0_i32 : i32
    %1 = arith.extui %0 : i1 to i32
    %c0_i32_0 = arith.constant 0 : i32
    %2 = arith.cmpi ne, %1, %c0_i32_0 : i32
    scf.if %2 {
      %cst_27 = arith.constant 0.000000e+00 : f32
      %31 = vector.broadcast %cst_27 : f32 to vector<11x128xf32>
      %c0_28 = arith.constant 0 : index
      %c0_29 = arith.constant 0 : index
      %32 = vector.load %arg5[%c0_28, %c0_29] : memref<11x128xf32, #tpu.memory_space<vmem>>, vector<11x128xf32>
      tpu.vector_store %arg5[%c0_28, %c0_29], %31 {strides = array<i32>} : memref<11x128xf32, #tpu.memory_space<vmem>>, vector<11x128xf32>,
      %cst_30 = arith.constant 0.000000e+00 : f32
      %33 = vector.broadcast %cst_30 : f32 to vector<11x128xf32>
      %c0_31 = arith.constant 0 : index
      %c0_32 = arith.constant 0 : index
      %34 = vector.load %arg6[%c0_31, %c0_32] : memref<11x128xf32, #tpu.memory_space<vmem>>, vector<11x128xf32>
      tpu.vector_store %arg6[%c0_31, %c0_32], %33 {strides = array<i32>} : memref<11x128xf32, #tpu.memory_space<vmem>>, vector<11x128xf32>,
      %cst_33 = arith.constant 0.000000e+00 : f32
      %35 = vector.broadcast %cst_33 : f32 to vector<11x128xf32>
      %c0_34 = arith.constant 0 : index
      %c0_35 = arith.constant 0 : index
      %36 = vector.load %arg7[%c0_34, %c0_35] : memref<11x128xf32, #tpu.memory_space<vmem>>, vector<11x128xf32>
      tpu.vector_store %arg7[%c0_34, %c0_35], %35 {strides = array<i32>} : memref<11x128xf32, #tpu.memory_space<vmem>>, vector<11x128xf32>,
    } else {
    }
    %c0 = arith.constant 0 : index
    %c0_1 = arith.constant 0 : index
    %c0_2 = arith.constant 0 : index
    %c0_3 = arith.constant 0 : index
    %3 = vector.load %arg2[%c0, %c0_1, %c0_2, %c0_3] : memref<1x11x2x128xf32, #tpu.memory_space<vmem>>, vector<1x11x2x128xf32>
    %4 = vector.shape_cast %3 : vector<1x11x2x128xf32> to vector<11x2x128xf32>
    %c0_4 = arith.constant 0 : index
    %c0_5 = arith.constant 0 : index
    %c0_6 = arith.constant 0 : index
    %c0_7 = arith.constant 0 : index
    %5 = vector.load %arg3[%c0_4, %c0_5, %c0_6, %c0_7] : memref<1x1x2x128xi32, #tpu.memory_space<vmem>>, vector<1x1x2x128xi32>
    %6 = vector.shape_cast %5 : vector<1x1x2x128xi32> to vector<2x128xi32>
    %7 = tpu.iota {dimensions = array<i32: 0>} : vector<11x2x128xi32>
    %8 = vector.shape_cast %6 : vector<2x128xi32> to vector<1x2x128xi32>
    %9 = vector.broadcast %8 : vector<1x2x128xi32> to vector<11x2x128xi32>
    %10 = arith.cmpi eq, %7, %9 : vector<11x2x128xi32>
    %c0_8 = arith.constant 0 : index
    %c0_9 = arith.constant 0 : index
    %11 = vector.load %arg5[%c0_8, %c0_9] : memref<11x128xf32, #tpu.memory_space<vmem>>, vector<11x128xf32>
    %cst = arith.constant 0.000000e+00 : f32
    %12 = vector.broadcast %cst : f32 to vector<11x2x128xf32>
    %13 = arith.select %10, %4, %12 : vector<11x2x128xi1>, vector<11x2x128xf32>
    %cst_10 = arith.constant dense<0.000000e+00> : vector<11x128xf32>
    %14 = vector.multi_reduction <add>, %13, %cst_10 [1] : vector<11x2x128xf32> to vector<11x128xf32>
    %15 = arith.addf %11, %14 : vector<11x128xf32>
    %c0_11 = arith.constant 0 : index
    %c0_12 = arith.constant 0 : index
    %16 = vector.load %arg5[%c0_11, %c0_12] : memref<11x128xf32, #tpu.memory_space<vmem>>, vector<11x128xf32>
    tpu.vector_store %arg5[%c0_11, %c0_12], %15 {strides = array<i32>} : memref<11x128xf32, #tpu.memory_space<vmem>>, vector<11x128xf32>,
    %c0_13 = arith.constant 0 : index
    %c0_14 = arith.constant 0 : index
    %17 = vector.load %arg6[%c0_13, %c0_14] : memref<11x128xf32, #tpu.memory_space<vmem>>, vector<11x128xf32>
    %cst_15 = arith.constant 1.000000e+00 : f32
    %cst_16 = arith.constant 0.000000e+00 : f32
    %18 = vector.broadcast %cst_15 : f32 to vector<11x2x128xf32>
    %19 = vector.broadcast %cst_16 : f32 to vector<11x2x128xf32>
    %20 = arith.select %10, %18, %19 : vector<11x2x128xi1>, vector<11x2x128xf32>
    %cst_17 = arith.constant dense<0.000000e+00> : vector<11x128xf32>
    %21 = vector.multi_reduction <add>, %20, %cst_17 [1] : vector<11x2x128xf32> to vector<11x128xf32>
    %22 = arith.addf %17, %21 : vector<11x128xf32>
    %c0_18 = arith.constant 0 : index
    %c0_19 = arith.constant 0 : index
    %23 = vector.load %arg6[%c0_18, %c0_19] : memref<11x128xf32, #tpu.memory_space<vmem>>, vector<11x128xf32>
    tpu.vector_store %arg6[%c0_18, %c0_19], %22 {strides = array<i32>} : memref<11x128xf32, #tpu.memory_space<vmem>>, vector<11x128xf32>,
    %c0_20 = arith.constant 0 : index
    %c0_21 = arith.constant 0 : index
    %24 = vector.load %arg7[%c0_20, %c0_21] : memref<11x128xf32, #tpu.memory_space<vmem>>, vector<11x128xf32>
    %cst_22 = arith.constant dense<0.000000e+00> : vector<11x128xf32>
    %25 = vector.multi_reduction <add>, %4, %cst_22 [1] : vector<11x2x128xf32> to vector<11x128xf32>
    %26 = arith.addf %24, %25 : vector<11x128xf32>
    %c0_23 = arith.constant 0 : index
    %c0_24 = arith.constant 0 : index
    %27 = vector.load %arg7[%c0_23, %c0_24] : memref<11x128xf32, #tpu.memory_space<vmem>>, vector<11x128xf32>
    tpu.vector_store %arg7[%c0_23, %c0_24], %26 {strides = array<i32>} : memref<11x128xf32, #tpu.memory_space<vmem>>, vector<11x128xf32>,
    %c0_i32_25 = arith.constant 0 : i32
    %28 = arith.cmpi eq, %arg1, %c0_i32_25 : i32
    %29 = arith.extui %28 : i1 to i32
    %c0_i32_26 = arith.constant 0 : i32
    %30 = arith.cmpi ne, %29, %c0_i32_26 : i32
    scf.if %30 {
      %c0_27 = arith.constant 0 : index
      %c0_28 = arith.constant 0 : index
      %31 = vector.load %arg5[%c0_27, %c0_28] : memref<11x128xf32, #tpu.memory_space<vmem>>, vector<11x128xf32>
      %cst_29 = arith.constant dense<0.000000e+00> : vector<11xf32>
      %32 = vector.multi_reduction <add>, %31, %cst_29 [1] : vector<11x128xf32> to vector<11xf32>
      %33 = vector.shape_cast %32 : vector<11xf32> to vector<11x1xf32>
      %c0_30 = arith.constant 0 : index
      %c0_31 = arith.constant 0 : index
      %34 = vector.load %arg6[%c0_30, %c0_31] : memref<11x128xf32, #tpu.memory_space<vmem>>, vector<11x128xf32>
      %cst_32 = arith.constant dense<0.000000e+00> : vector<11xf32>
      %35 = vector.multi_reduction <add>, %34, %cst_32 [1] : vector<11x128xf32> to vector<11xf32>
      %36 = vector.shape_cast %35 : vector<11xf32> to vector<11x1xf32>
      %c0_33 = arith.constant 0 : index
      %c0_34 = arith.constant 0 : index
      %37 = vector.load %arg7[%c0_33, %c0_34] : memref<11x128xf32, #tpu.memory_space<vmem>>, vector<11x128xf32>
      %cst_35 = arith.constant dense<0.000000e+00> : vector<11xf32>
      %38 = vector.multi_reduction <add>, %37, %cst_35 [1] : vector<11x128xf32> to vector<11xf32>
      %39 = vector.shape_cast %38 : vector<11xf32> to vector<11x1xf32>
      %40 = arith.addf %36, %39 : vector<11x1xf32>
      %41 = arith.subf %40, %33 : vector<11x1xf32>
      %42 = arith.divf %33, %41 : vector<11x1xf32>
      %43 = tpu.iota {dimensions = array<i32: 0>} : vector<11x1xi32>
      %c1_i32 = arith.constant 1 : i32
      %44 = vector.broadcast %c1_i32 : i32 to vector<11x1xi32>
      %45 = arith.cmpi sge, %43, %44 : vector<11x1xi32>
      %cst_36 = arith.constant 0.000000e+00 : f32
      %46 = vector.broadcast %cst_36 : f32 to vector<11x1xf32>
      %47 = arith.select %45, %42, %46 : vector<11x1xi1>, vector<11x1xf32>
      %48 = vector.shape_cast %47 : vector<11x1xf32> to vector<1x11x1xf32>
      %cst_37 = arith.constant dense<0.000000e+00> : vector<1xf32>
      %49 = vector.multi_reduction <add>, %48, %cst_37 [1, 2] : vector<1x11x1xf32> to vector<1xf32>
      %50 = vector.shape_cast %49 : vector<1xf32> to vector<1x1x1xf32>
      %51 = vector.extract %50[0, 0, 0] : f32 from vector<1x1x1xf32>
      %cst_38 = arith.constant 1.000000e+01 : f32
      %52 = arith.divf %51, %cst_38 : f32
      %cst_39 = arith.constant 1.000000e+00 : f32
      %53 = arith.subf %cst_39, %52 : f32
      %54 = vector.broadcast %53 : f32 to vector<1x1x128xf32>
      %c0_40 = arith.constant 0 : index
      %c0_41 = arith.constant 0 : index
      %c0_42 = arith.constant 0 : index
      %55 = vector.load %arg4[%c0_40, %c0_41, %c0_42] : memref<1x1x128xf32, #tpu.memory_space<vmem>>, vector<1x1x128xf32>
      tpu.vector_store %arg4[%c0_40, %c0_41, %c0_42], %54 {strides = array<i32>} : memref<1x1x128xf32, #tpu.memory_space<vmem>>, vector<1x1x128xf32>,
    } else {
    }
    return
  }
  func.func @transform_0(%arg0: i32, %arg1: i32) -> (i32, i32, i32, i32) {
    %c0_i32 = arith.constant 0 : i32
    %c0_i32_0 = arith.constant 0 : i32
    %c0_i32_1 = arith.constant 0 : i32
    return %arg0, %c0_i32, %arg1, %c0_i32_0 : i32, i32, i32, i32
  }
  func.func @transform_1(%arg0: i32, %arg1: i32) -> (i32, i32, i32, i32) {
    %c0_i32 = arith.constant 0 : i32
    %c0_i32_0 = arith.constant 0 : i32
    %c0_i32_1 = arith.constant 0 : i32
    return %arg0, %c0_i32, %arg1, %c0_i32_0 : i32, i32, i32, i32
  }
  func.func @transform_2(%arg0: i32, %arg1: i32) -> (i32, i32, i32) {
    %c0_i32 = arith.constant 0 : i32
    %c0_i32_0 = arith.constant 0 : i32
    %c0_i32_1 = arith.constant 0 : i32
    return %arg0, %c0_i32, %c0_i32_0 : i32, i32, i32
  }
}

</mosaic_0001>

<bundles_post_ra>
// kernel: tpu_custom_call.1
= control target key start
LH: loop header
LB: loop body
LE: loop exit
PB: predicated region body
PF: predicated region fallthrough
CT: control target
= control target key end

     0   :  { %7 = vsyncpa [#allocation6], 0  ;;  %s1437_s0 = inlined_call_operand.hbm [shape: f32[2,11,2,128], index: 0, kind: input, shape index: {}]   ;;  %s1438_s1 = inlined_call_operand.hbm [shape: s32[2,1,2,128], index: 1, kind: input, shape index: {}]   ;;  %s1439_s2 = inlined_call_operand.hbm [shape: f32[2,1,128], index: 2, kind: output, shape index: {}]  }
   0x1   :  { %9 = vsyncpa [#allocation6 + $0x1], 0 }
   0x2   :  { %10 = vsyncpa [#allocation9], 0 }
   0x3   :  { %12 = vsyncpa [#allocation9 + $0x1], 0 }
   0x4   :  { %13 = vsyncpa [#allocation7], 0 }
   0x5   :  { %15 = vsyncpa [#allocation7 + $0x1], 0  ;;  %s1027_s9 = smov 0   ;;  %s1029_s10 = smov 0  }
   0x6   :  { %s1031_s11 = smov 0   ;;  %s1033_s12 = smov 0  }
   0x7   :  { %s1035_s13 = smov 0   ;;  %s1037_s14 = smov 0  }
   0x8 LB: > { %s767_s15 = sadd.s32 4294967295, %s1004_s14   ;;  %s768_s16 = sadd.s32 4294967294, %s1004_s14   ;;  %s1004_s14 = sphi %s1037_s14, %s21_s14   ;;  %s1000_s13 = sphi %s1035_s13, %s1475_s13   ;;  %s996_s12 = sphi %s1033_s12, %s1474_s12   ;;  %s992_s11 = sphi %s1031_s11, %s1473_s11   ;;  %s988_s10 = sphi %s1029_s10, %s1472_s10   ;;  %s984_s9 = sphi %s1027_s9, %s1471_s9  }
   0x9   : > { %s33_s17 = sadd.s32 1, %s1000_s13  ;;  %s42_s18 = sadd.s32 1, %s992_s11 }
   0xa   : > { %p35_p0 = scmp.ge.s32.totalorder %s33_s17, 2  ;;  %p49_p1 = scmp.ne.s32.totalorder %s992_s11, %s988_s10 }
   0xb   : > { %p50_p2 = scmp.eq.s32.totalorder %s1004_s14, 0  ;;  %p55_p3 = scmp.ne.s32.totalorder %s988_s10, %s984_s9 }
   0xc   : > { %s1477_s17 = smov (%p35_p0, %s33_s17), 0  ;;  %p56_p5 = scmp.eq.s32.totalorder %s767_s15, 0 }
   0xd   : > { %p1068_p4 = por %p50_p2, %p49_p1  ;;  %s37_s20 = ssub.s32 %s1000_s13, %s1477_s17 }
   0xe   : > { %p107_p6 = scmp.eq.s32.totalorder %s767_s15, 1  ;;  %p40_p7 = scmp.eq.s32.totalorder %s37_s20, 0 }
   0xf   : > { %p1074_p8 = por %p56_p5, %p55_p3  ;;  %p113_p10 = scmp.eq.s32.totalorder %s768_s16, 1 }
  0x10   : > { %p1078_p9 = por %p107_p6, %p49_p1  ;;  %p801_p13 = scmp.lt.s32.totalorder %s1004_s14, 2 }
  0x11   : > { %s1450_s21 = scalar_select %p1074_p8, 1, 0 }
  0x12   : > { %s1451_s22 = scalar_select %p1078_p9, 1, 0 }
  0x13   : > { %s1083_s23 = scalar_select %p40_p7, %s992_s11, %s42_s18  }
  0x14   : > { %p1085_p11 = por %p113_p10, %p55_p3  ;;  %s1092_s25 = sand.u32 1, %s992_s11  }
  0x15   : > { %s779_s26 = smul.u32 22, %s1092_s25  ;;  %p1098_p0 = pnand %p801_p13, %p1068_p4 }
  0x16   : > { %s1452_s24 = scalar_select %p1085_p11, 1, 0 }
  0x17   : > { %s780_s27 = smul.u32 352, %s1000_s13  ;;  %s137_s4 = scalar_lea.vmem [#allocation5], %s779_s26 }
  0x18   : > { %s145_s5 = sshll.u32 %s137_s4, 4  ;;  %s134_s6 = scalar_lea.sflag [#allocation6], %s1092_s25  ;;  %s1107_s5 = int_to_ptr.vmem [resolvable:$true] %s145_s5 }
  0x19   : > { %s1105_s3 = scalar_lea.hbm %s1437_s0, %s780_s27  ;;  %p860_p3 = pneg %p1098_p0 }
  0x1a   : > { %s858_s7 = scalar_lea.hbm %s1105_s3, 352  ;;  %s863_s16 = scalar_lea.hbm %s1437_s0, 704 }
  0x1b   : > { %p859_p2 = scmp.ne.s32.totalorder %s1105_s3, %s858_s7  ;;  %p864_p6 = scmp.lt.u32.totalorder %s1105_s3, %s1437_s0 }
  0x1c   : > { %p865_p7 = scmp.lt.u32.totalorder %s863_s16, %s858_s7  ;;  %p867_p13 = scmp.lt.u32.totalorder %s858_s7, %s1105_s3 }
  0x1d   : > { %p861_p4 = pnand %p860_p3, %p859_p2 }
  0x1e   : > { %p866_p10 = por %p865_p7, %p864_p6 }
  0x1f   : > { %p862_p5 = pneg %p861_p4 }
  0x20   : > { %p868_p12 = por %p867_p13, %p866_p10 }
  0x22   : > { %p869_p1 = pnand %p868_p12, %p862_p5 }
  0x24   : > { %872 = shalt.err (!%p869_p1)
}
  0x25   : > { %s873_s20 = scalar_lea.vmem %s1107_s5, 352  ;;  %s1006_s26 = smov [#allocation5]  }
  0x26   : > { %p874_p2 = scmp.ne.s32.totalorder %s1107_s5, %s873_s20  ;;  %s878_s27 = sshll.u32 %s1006_s26, 4  ;;  %s879_s27 = int_to_ptr.vmem [resolvable:$false] %s878_s27 }
  0x27   : > { %s880_s29 = scalar_lea.vmem %s879_s27, 704  ;;  %p881_p9 = scmp.lt.s32.totalorder %s1107_s5, %s879_s27 }
  0x28   : > { %p876_p4 = pnand %p874_p2, %p860_p3  ;;  %p882_p6 = scmp.lt.s32.totalorder %s880_s29, %s873_s20 }
  0x2a   : > { %p877_p11 = pneg %p876_p4  ;;  %p883_p7 = por %p882_p6, %p881_p9 }
  0x2c   : > { %p884_p10 = pnand %p883_p7, %p877_p11 }
  0x2e   : > { %887 = shalt.err (!%p884_p10)
}
  0x2f   : > { %s1007_s30 = smov 32   ;;  %s1008_s4 = smov 2  }
  0x30   : > { %793 = dma.hbm_to_vmem [thread:$0]  (!%p1098_p0), %s1105_s3, 352, %s1107_s5, %s134_s6, %s1007_s30, %s1007_s30, %s1008_s4  }
  0x31   : > { %p172_p12 = scmp.lt.s32.totalorder %s1004_s14, 3  ;;  %s772_s7 = sshll.u32 %s1092_s25, 1 }
  0x32   : > { %s773_s8 = sshll.u32 %s1000_s13, 5  ;;  %p1454_p9 = scmp.ge.s32.totalorder %s1004_s14, 1 }
  0x33   : > { %s1150_s19 = scalar_lea.hbm %s1438_s1, %s773_s8  ;;  %s159_s20 = scalar_lea.vmem [#allocation8], %s772_s7 }
  0x34   : > { %p1143_p11 = pnand %p1454_p9, %p172_p12  ;;  %s167_s26 = sshll.u32 %s159_s20, 4  ;;  %s168_s26 = int_to_ptr.vmem [resolvable:$true] %s167_s26 }
  0x35   : > { %s156_s3 = scalar_lea.sflag [#allocation9], %s1092_s25  ;;  %s888_s5 = scalar_lea.hbm %s1150_s19, 32 }
  0x36   : > { %s1455_s15 = scalar_select %p1143_p11, 1, 0 }
  0x37   : > { %p889_p1 = scmp.ne.s32.totalorder %s1150_s19, %s888_s5  ;;  %s893_s29 = scalar_lea.hbm %s1438_s1, 64 }
  0x38   : > { %p894_p2 = scmp.lt.u32.totalorder %s1150_s19, %s1438_s1  ;;  %p895_p4 = scmp.lt.u32.totalorder %s893_s29, %s888_s5 }
  0x39   : > { %p891_p5 = pnand %p889_p1, %p860_p3  ;;  %p897_p7 = scmp.lt.u32.totalorder %s888_s5, %s1150_s19 }
  0x3a   : > { %p896_p6 = por %p895_p4, %p894_p2 }
  0x3b   : > { %p892_p13 = pneg %p891_p5 }
  0x3c   : > { %p898_p10 = por %p897_p7, %p896_p6 }
  0x3e   : > { %p899_p12 = pnand %p898_p10, %p892_p13 }
  0x40   : > { %902 = shalt.err (!%p899_p12)
}
  0x41   : > { %s903_s25 = scalar_lea.vmem %s168_s26, 32  ;;  %s1009_s7 = smov [#allocation8]  }
  0x42   : > { %p904_p9 = scmp.ne.s32.totalorder %s168_s26, %s903_s25  ;;  %s908_s8 = sshll.u32 %s1009_s7, 4  ;;  %s909_s8 = int_to_ptr.vmem [resolvable:$false] %s908_s8 }
  0x43   : > { %s910_s16 = scalar_lea.vmem %s909_s8, 64  ;;  %p911_p8 = scmp.lt.s32.totalorder %s168_s26, %s909_s8 }
  0x44   : > { %p906_p1 = pnand %p904_p9, %p860_p3  ;;  %p912_p11 = scmp.lt.s32.totalorder %s910_s16, %s903_s25 }
  0x46   : > { %p907_p5 = pneg %p906_p1  ;;  %p913_p2 = por %p912_p11, %p911_p8 }
  0x48   : > { %p914_p4 = pnand %p913_p2, %p907_p5 }
  0x4a   : > { %917 = shalt.err (!%p914_p4)
}
  0x4b   : > { %796 = dma.hbm_to_vmem [thread:$0]  (!%p1098_p0), %s1150_s19, 32, %s168_s26, %s156_s3  }
  0x4c   : > { %p1456_p13 = scmp.ne.s32.totalorder %s1455_s15, 0 }
  0x4d   : > { %s1175_s18 = sand.u32 (!%p1456_p13), 1, %s988_s10   ;;  %p1457_p8 = scmp.ne.s32.totalorder (!%p1456_p13), %s1450_s21, 0 }
  0x4e   : > { %176 = sbr.rel (%p1456_p13) target bundleno = 560 (0x230), region = 28  ;;  %s179_s5 = scalar_lea.sflag (!%p1456_p13), [#allocation6], %s1175_s18 }
  0x4f   : > { %s781_s20 = smul.u32 (!%p1456_p13), 22, %s1175_s18 }
  0x51   : > { %s1179_s6 = scalar_lea.vmem (!%p1456_p13), [#allocation5], %s781_s20 }
  0x55   : > { %971 = dma.done.wait (%p1457_p8), %s179_s5, 352  }
  0x56   : > { %973 = vsyncadd (%p1457_p8), %s179_s5, 4294966944  ;;  %s775_s28 = sshll.u32 %s1175_s18, 1  ;;  %s188_s15 = scalar_lea.sflag [#allocation9], %s1175_s18 }
  0x57   : > { %s1187_s19 = scalar_lea.vmem [#allocation8], %s775_s28 }
  0x58   : > { %975 = dma.done.wait (%p1457_p8), %s188_s15, 32  }
  0x59   : > { %977 = vsyncadd (%p1457_p8), %s188_s15, 4294967264  ;;  %v1010_v0 = vmov 0.0   ;;  %vm262_vm0 = vcmask 1041408   ;;  %v1197_v1 = vld [vmem:[%s1179_s6 + $0x10] sm:$0x3]  ;;  %vm1448_vm1 = vcmask 1041409  }
  0x5a   : > { %225 = vst [vmem:[#allocation4 + $0x8] sm:$0x7] %v1010_v0  ;;  %221 = vst [vmem:[#allocation2 + $0x8] sm:$0x7] %v1010_v0  ;;  %v1200_v2 = vld [vmem:[%s1179_s6 + $0x12] sm:$0x3] }
  0x5b   : > { %223 = vst [vmem:[#allocation3 + $0x8] sm:$0x7] %v1010_v0  ;;  %v1203_v3 = vld [vmem:[%s1179_s6 + $0x14] sm:$0x3]  ;;  %v547_v4 = vsel %vm262_vm0, %v1197_v1, 0.0  ;;  %v554_v5 = vsel %vm262_vm0, %v1200_v2, 0.0 }
  0x5c   : > { %v561_v6 = vsel %vm262_vm0, %v1203_v3, 0.0  ;;  %v548_v7 = vrot.slane %v547_v4, 4  ;;  %v555_v8 = vrot.slane %v554_v5, 4  ;;  %v1212_v10 = vld [vmem:[%s1179_s6] sm:$0x3]  ;;  %vm353_vm2 = vcmask 1042434  }
  0x5d   : > { %v562_v9 = vrot.slane %v561_v6, 4  ;;  %v1215_v11 = vld [vmem:[%s1179_s6 + $0x2] sm:$0x3]  ;;  %v1218_v12 = vld [vmem:[%s1179_s6 + $0x4] sm:$0x3]  ;;  %v491_v18 = vsel %vm262_vm0, %v1212_v10, 0.0 }
  0x5e   : > { %v1221_v13 = vld [vmem:[%s1179_s6 + $0x6] sm:$0x3]  ;;  %v549_v14 = vadd.f32 %v548_v7, %v547_v4  ;;  %v556_v15 = vadd.f32 %v555_v8, %v554_v5  ;;  %v1224_v17 = vld [vmem:[%s1179_s6 + $0x8] sm:$0x3]  ;;  %v498_v19 = vsel %vm262_vm0, %v1215_v11, 0.0  ;;  %v505_v20 = vsel %vm262_vm0, %v1218_v12, 0.0 }
  0x5f   : > { %v563_v16 = vadd.f32 %v562_v9, %v561_v6  ;;  %v512_v21 = vsel %vm262_vm0, %v1221_v13, 0.0  ;;  %v492_v25 = vrot.slane %v491_v18, 4  ;;  %v499_v26 = vrot.slane %v498_v19, 4  ;;  %v1237_v41 = vld [vmem:[%s1179_s6 + $0xa] sm:$0x3]  ;;  %s776_s26 = sshll.u32 %s996_s12, 4 }
  0x60   : > { %v550_v22 = vrot.slane %v549_v14, 2  ;;  %v557_v23 = vrot.slane %v556_v15, 2  ;;  %v506_v27 = vrot.slane %v505_v20, 4  ;;  %v513_v28 = vrot.slane %v512_v21, 4  ;;  %v1240_v43 = vld [vmem:[%s1179_s6 + $0xc] sm:$0x3]  ;;  %s1388_s7 = scalar_lea.hbm %s1439_s2, %s776_s26 }
  0x61   : > { %v564_v24 = vrot.slane %v563_v16, 2  ;;  %v519_v29 = vsel %vm262_vm0, %v1224_v17, 0.0  ;;  %v493_v33 = vadd.f32 %v492_v25, %v491_v18  ;;  %v500_v34 = vadd.f32 %v499_v26, %v498_v19  ;;  %v490_v52 = vld [vmem:[#allocation4 + $0x8] sm:$0x7]  ;;  %v1244_v58 = vld [vmem:[%s1179_s6 + $0xe] sm:$0x3] }
  0x62   : > { %v551_v30 = vadd.f32 %v550_v22, %v549_v14  ;;  %v558_v31 = vadd.f32 %v557_v23, %v556_v15  ;;  %v507_v35 = vadd.f32 %v506_v27, %v505_v20  ;;  %v514_v36 = vadd.f32 %v513_v28, %v512_v21  ;;  %v1252_v6 = vld [vmem:[%s1187_s19] sm:$0x3]  ;;  %s215_s27 = scalar_lea.vmem [#allocation10], %s1175_s18  ;;  %s655_s8 = scalar_lea.sflag [#allocation7], %s1175_s18 }
  0x63   : > { %v565_v32 = vadd.f32 %v564_v24, %v563_v16  ;;  %v520_v37 = vrot.slane %v519_v29, 4  ;;  %vm1445_vm3 = vcmask 1043459   ;;  %v494_v42 = vrot.slane %v493_v33, 2  ;;  %s667_s29 = sshll.u32 %s215_s27, 4  ;;  %p1468_p3 = scmp.ne.s32.totalorder %s1451_s22, 0  ;;  %s1390_s29 = int_to_ptr.vmem [resolvable:$true] %s667_s29 }
  0x64   : > { %v552_v38 = vrot.slane %v551_v30, 1  ;;  %v559_v39 = vrot.slane %v558_v31, 1  ;;  %vm1442_vm4 = vcmask 1044484   ;;  %v501_v44 = vrot.slane %v500_v34, 2  ;;  %s918_s16 = scalar_lea.vmem %s1390_s29, 16  ;;  %s1011_s12 = smov [#allocation10]  }
  0x65   : > { %v566_v40 = vrot.slane %v565_v32, 1  ;;  %v508_v45 = vrot.slane %v507_v35, 2  ;;  %v515_v46 = vrot.slane %v514_v36, 2  ;;  %v521_v47 = vadd.f32 %v520_v37, %v519_v29  ;;  %p919_p0 = scmp.ne.s32.totalorder %s1390_s29, %s918_s16  ;;  %s922_s20 = sshll.u32 %s1011_s12, 4  ;;  %s923_s20 = int_to_ptr.vmem [resolvable:$false] %s922_s20 }
  0x66   : > { %v553_v48 = vadd.f32 %v552_v38, %v551_v30  ;;  %v560_v49 = vadd.f32 %v559_v39, %v558_v31  ;;  %v495_v51 = vadd.f32 %v494_v42, %v493_v33  ;;  %v502_v53 = vadd.f32 %v501_v44, %v500_v34  ;;  %s924_s5 = scalar_lea.vmem %s923_s20, 32  ;;  %p925_p7 = scmp.lt.s32.totalorder %s1390_s29, %s923_s20 }
  0x67   : > { %v567_v50 = vadd.f32 %v566_v40, %v565_v32  ;;  %v509_v54 = vadd.f32 %v508_v45, %v507_v35  ;;  %v516_v55 = vadd.f32 %v515_v46, %v514_v36  ;;  %v522_v56 = vrot.slane %v521_v47, 2  ;;  %p920_p11 = pnand %p919_p0, %p1468_p3  ;;  %p926_p10 = scmp.lt.s32.totalorder %s924_s5, %s918_s16 }
  0x68   : > { %v586_v57 = vsel %vm1448_vm1, %v560_v49, %v553_v48  ;;  %v496_v59 = vrot.slane %v495_v51, 1  ;;  %v526_v60 = vsel %vm262_vm0, %v1237_v41, 0.0  ;;  %v533_v61 = vsel %vm262_vm0, %v1240_v43, 0.0 }
  0x69   : > { %v587_v62 = vsel %vm353_vm2, %v567_v50, %v586_v57  ;;  %vm1446_vm5 = vcmask 1042432   ;;  %v503_v63 = vrot.slane %v502_v53, 1  ;;  %v510_v4 = vrot.slane %v509_v54, 1  ;;  %p921_p6 = pneg %p920_p11  ;;  %p927_p12 = por %p926_p10, %p925_p7 }
  0x6a   : > { %v517_v5 = vrot.slane %v516_v55, 1  ;;  %v591_v7 = vadd.f32 %v587_v62, %v490_v52  ;;  %v497_v8 = vadd.f32 %v496_v59, %v495_v51  ;;  %v523_v9 = vadd.f32 %v522_v56, %v521_v47 }
  0x6b   : > { %v527_v14 = vrot.slane %v526_v60, 4  ;;  %vm1444_vm6 = vcmask 1045509   ;;  %v504_v15 = vadd.f32 %v503_v63, %v502_v53  ;;  %v511_v16 = vadd.f32 %v510_v4, %v509_v54  ;;  %p928_p9 = pnand %p927_p12, %p921_p6 }
  0x6c   : > { %v518_v18 = vadd.f32 %v517_v5, %v516_v55  ;;  %v534_v19 = vrot.slane %v533_v61, 4  ;;  %593 = vst [vmem:[#allocation4 + $0x8] sm:$0x7] %v591_v7  ;;  %vm361_vm7 = vcmask 1046534   ;;  %v524_v20 = vrot.slane %v523_v9, 1 }
  0x6d   : > { %v528_v21 = vadd.f32 %v527_v14, %v526_v60  ;;  %v540_v22 = vsel %vm262_vm0, %v1244_v58, 0.0  ;;  %vm246_vm8 = vcmp.eq.s32.totalorder %v1252_v6, 8  ;;  %v579_v25 = vsel %vm1448_vm1, %v504_v15, %v497_v8 }
  0x6e   : > { %v535_v23 = vadd.f32 %v534_v19, %v533_v61  ;;  %v541_v24 = vrot.slane %v540_v22, 4  ;;  %vm247_vm9 = vcmp.eq.s32.totalorder %v1252_v6, 9  ;;  %vm363_vm10 = vcmask 1047559  }
  0x6f   : > { %v525_v26 = vadd.f32 %v524_v20, %v523_v9  ;;  %v529_v27 = vrot.slane %v528_v21, 2  ;;  %v580_v28 = vsel %vm353_vm2, %v511_v16, %v579_v25  ;;  %vm1443_vm11 = vcmp.eq.s32.totalorder %v1252_v6, 10 }
  0x70   : > { %v536_v29 = vrot.slane %v535_v23, 2  ;;  %v542_v30 = vadd.f32 %v541_v24, %v540_v22  ;;  %v581_v31 = vsel %vm1445_vm3, %v518_v18, %v580_v28  ;;  %v383_v32 = vsel %vm246_vm8, 1.0, %v1010_v0 }
  0x71   : > { %v530_v33 = vadd.f32 %v529_v27, %v528_v21  ;;  %v582_v34 = vsel %vm1442_vm4, %v525_v26, %v581_v31  ;;  %v384_v35 = vsel %vm247_vm9, 1.0, %v1010_v0  ;;  %v385_v36 = vsel %vm1443_vm11, 1.0, %v1010_v0  ;;  %v374_v26 = vld [vmem:[#allocation3 + $0x8] sm:$0x7] }
  0x72   : > { %v537_v37 = vadd.f32 %v536_v29, %v535_v23  ;;  %v543_v38 = vrot.slane %v542_v30, 2  ;;  %v442_v39 = vsel %vm262_vm0, %v383_v32, 0.0  ;;  %v449_v40 = vsel %vm262_vm0, %v384_v35, 0.0 }
  0x73   : > { %v531_v42 = vrot.slane %v530_v33, 1  ;;  %v443_v44 = vrot.slane %v442_v39, 4  ;;  %v450_v45 = vrot.slane %v449_v40, 4  ;;  %v456_v46 = vsel %vm262_vm0, %v385_v36, 0.0  ;;  %v613_v47 = vld [vmem:[#allocation4 + $0x8] sm:$0x7] }
  0x74   : > { %v538_v48 = vrot.slane %v537_v37, 1  ;;  %v544_v49 = vadd.f32 %v543_v38, %v542_v30  ;;  %v457_v50 = vrot.slane %v456_v46, 4  ;;  %vm238_vm12 = vcmp.eq.s32.totalorder %v1252_v6, 0 }
  0x75   : > { %v616_v51 = vsel %vm1446_vm5, %v613_v47, 0.0  ;;  %v532_v52 = vadd.f32 %v531_v42, %v530_v33  ;;  %v444_v53 = vadd.f32 %v443_v44, %v442_v39  ;;  %v451_v54 = vadd.f32 %v450_v45, %v449_v40 }
  0x76   : > { %617 = vadd.xlane.f32.xlu1 %v616_v51  ;;  %v539_v55 = vadd.f32 %v538_v48, %v537_v37  ;;  %v545_v56 = vrot.slane %v544_v49, 1  ;;  %v458_v57 = vadd.f32 %v457_v50, %v456_v46  ;;  %vm239_vm13 = vcmp.eq.s32.totalorder %v1252_v6, 1 }
  0x77   : > { %v583_v59 = vsel %vm1444_vm6, %v532_v52, %v582_v34  ;;  %v445_v60 = vrot.slane %v444_v53, 2  ;;  %v452_v61 = vrot.slane %v451_v54, 2  ;;  %vm240_vm14 = vcmp.eq.s32.totalorder %v1252_v6, 2 }
  0x78   : > { %v546_v62 = vadd.f32 %v545_v56, %v544_v49  ;;  %v584_v63 = vsel %vm361_vm7, %v539_v55, %v583_v59  ;;  %v459_v4 = vrot.slane %v458_v57, 2  ;;  %vm241_vm15 = vcmp.eq.s32.totalorder %v1252_v6, 3 }
  0x79   : > { %v446_v5 = vadd.f32 %v445_v60, %v444_v53  ;;  %v453_v7 = vadd.f32 %v452_v61, %v451_v54  ;;  %vm242_vm4 = vcmp.eq.s32.totalorder %v1252_v6, 4  ;;  %vm243_vm11 = vcmp.eq.s32.totalorder %v1252_v6, 5 }
  0x7a   : > { %v585_v8 = vsel %vm363_vm10, %v546_v62, %v584_v63  ;;  %v460_v9 = vadd.f32 %v459_v4, %v458_v57  ;;  %vm244_vm6 = vcmp.eq.s32.totalorder %v1252_v6, 6  ;;  %vm1447_vm3 = vcmp.eq.s32.totalorder %v1252_v6, 7 }
  0x7b   : > { %v447_v14 = vrot.slane %v446_v5, 1  ;;  %v454_v15 = vrot.slane %v453_v7, 1  ;;  %v375_v16 = vsel %vm238_vm12, 1.0, %v1010_v0  ;;  %v376_v19 = vsel %vm239_vm13, 1.0, %v1010_v0  ;;  %614 = vadd.xlane.f32.xlu0 %v585_v8 }
  0x7c   : > { %v461_v18 = vrot.slane %v460_v9, 1  ;;  %v377_v20 = vsel %vm240_vm14, 1.0, %v1010_v0  ;;  %v378_v21 = vsel %vm241_vm15, 1.0, %v1010_v0  ;;  %v379_v24 = vsel %vm242_vm4, 1.0, %v1010_v0 }
  0x7d   : > { %v448_v22 = vadd.f32 %v447_v14, %v446_v5  ;;  %v455_v23 = vadd.f32 %v454_v15, %v453_v7  ;;  %v380_v25 = vsel %vm243_vm11, 1.0, %v1010_v0  ;;  %v381_v28 = vsel %vm244_vm6, 1.0, %v1010_v0 }
  0x7e   : > { %v462_v27 = vadd.f32 %v461_v18, %v460_v9  ;;  %v382_v29 = vsel %vm1447_vm3, 1.0, %v1010_v0  ;;  %v386_v30 = vsel %vm262_vm0, %v375_v16, 0.0  ;;  %v393_v33 = vsel %vm262_vm0, %v376_v19, 0.0 }
  0x7f   : > { %v481_v31 = vsel %vm1448_vm1, %v455_v23, %v448_v22  ;;  %v387_v32 = vrot.slane %v386_v30, 4  ;;  %v400_v34 = vsel %vm262_vm0, %v377_v20, 0.0  ;;  %v394_v36 = vrot.slane %v393_v33, 4 }
  0x80   : > { %v482_v35 = vsel %vm353_vm2, %v462_v27, %v481_v31  ;;  %v401_v37 = vrot.slane %v400_v34, 4  ;;  %v407_v38 = vsel %vm262_vm0, %v378_v21, 0.0  ;;  %v414_v0 = vsel %vm262_vm0, %v379_v24, 0.0 }
  0x81   : > { %v486_v39 = vadd.f32 %v482_v35, %v374_v26  ;;  %v388_v40 = vadd.f32 %v387_v32, %v386_v30  ;;  %v408_v42 = vrot.slane %v407_v38, 4  ;;  %v395_v44 = vadd.f32 %v394_v36, %v393_v33 }
  0x82   : > { %v402_v45 = vadd.f32 %v401_v37, %v400_v34  ;;  %v415_v46 = vrot.slane %v414_v0, 4  ;;  %v421_v47 = vsel %vm262_vm0, %v380_v25, 0.0  ;;  %v428_v51 = vsel %vm262_vm0, %v381_v28, 0.0 }
  0x83   : > { %488 = vst [vmem:[#allocation3 + $0x8] sm:$0x7] %v486_v39  ;;  %v389_v48 = vrot.slane %v388_v40, 2  ;;  %v409_v49 = vadd.f32 %v408_v42, %v407_v38  ;;  %v422_v50 = vrot.slane %v421_v47, 4  ;;  %v396_v52 = vrot.slane %v395_v44, 2 }
  0x84   : > { %v403_v53 = vrot.slane %v402_v45, 2  ;;  %v416_v54 = vadd.f32 %v415_v46, %v414_v0  ;;  %v429_v55 = vrot.slane %v428_v51, 4  ;;  %v435_v60 = vsel %vm262_vm0, %v382_v29, 0.0 }
  0x85   : > { %v390_v56 = vadd.f32 %v389_v48, %v388_v40  ;;  %v410_v57 = vrot.slane %v409_v49, 2  ;;  %v423_v59 = vadd.f32 %v422_v50, %v421_v47  ;;  %v397_v61 = vadd.f32 %v396_v52, %v395_v44 }
  0x86   : > { %v404_v62 = vadd.f32 %v403_v53, %v402_v45  ;;  %v417_v63 = vrot.slane %v416_v54, 2  ;;  %v430_v4 = vadd.f32 %v429_v55, %v428_v51  ;;  %v436_v9 = vrot.slane %v435_v60, 4 }
  0x87   : > { %v391_v5 = vrot.slane %v390_v56, 1  ;;  %v411_v7 = vadd.f32 %v410_v57, %v409_v49  ;;  %v424_v8 = vrot.slane %v423_v59, 2  ;;  %v398_v14 = vrot.slane %v397_v61, 1 }
  0x88   : > { %v405_v15 = vrot.slane %v404_v62, 1  ;;  %v418_v16 = vadd.f32 %v417_v63, %v416_v54  ;;  %v431_v18 = vrot.slane %v430_v4, 2  ;;  %v437_v22 = vadd.f32 %v436_v9, %v435_v60 }
  0x89   : > { %v392_v19 = vadd.f32 %v391_v5, %v390_v56  ;;  %v412_v20 = vrot.slane %v411_v7, 1  ;;  %v425_v21 = vadd.f32 %v424_v8, %v423_v59  ;;  %v399_v24 = vadd.f32 %v398_v14, %v397_v61 }
  0x8a   : > { %v606_v23 = vld [vmem:[#allocation3 + $0x8] sm:$0x7]  ;;  %v406_v25 = vadd.f32 %v405_v15, %v404_v62  ;;  %v419_v26 = vrot.slane %v418_v16, 1  ;;  %v432_v27 = vadd.f32 %v431_v18, %v430_v4  ;;  %v438_v31 = vrot.slane %v437_v22, 2 }
  0x8b   : > { %v609_v28 = vsel %vm1446_vm5, %v606_v23, 0.0  ;;  %v413_v29 = vadd.f32 %v412_v20, %v411_v7  ;;  %v426_v30 = vrot.slane %v425_v21, 1  ;;  %v474_v34 = vsel %vm1448_vm1, %v399_v24, %v392_v19 }
  0x8c   : > { %610 = vadd.xlane.f32.xlu1 %v609_v28  ;;  %v420_v32 = vadd.f32 %v419_v26, %v418_v16  ;;  %v433_v33 = vrot.slane %v432_v27, 1  ;;  %v259_v35 = vsel %vm246_vm8, %v1197_v1, 0.0  ;;  %v439_v37 = vadd.f32 %v438_v31, %v437_v22 }
  0x8d   : > { %v427_v36 = vadd.f32 %v426_v30, %v425_v21  ;;  %v475_v38 = vsel %vm353_vm2, %v406_v25, %v474_v34  ;;  %v260_v39 = vsel %vm247_vm9, %v1200_v2, 0.0  ;;  %vm1458_vm5 = vcmask 1043459  }
  0x8e   : > { %v434_v40 = vadd.f32 %v433_v33, %v432_v27  ;;  %v476_v42 = vsel %vm1458_vm5, %v413_v29, %v475_v38  ;;  %vm1459_vm3 = vcmp.eq.s32.totalorder %v1252_v6, 10  ;;  %v319_v44 = vsel %vm262_vm0, %v259_v35, 0.0  ;;  %v250_v27 = vld [vmem:[#allocation2 + $0x8] sm:$0x7] }
  0x8f   : > { %v261_v0 = vsel %vm1459_vm3, %v1203_v3, 0.0  ;;  %v440_v45 = vrot.slane %v439_v37, 1  ;;  %vm1460_vm1 = vcmask 1044484   ;;  %v320_v46 = vrot.slane %v319_v44, 4 }
  0x90   : > { %v477_v1 = vsel %vm1460_vm1, %v420_v32, %v476_v42  ;;  %v326_v47 = vsel %vm262_vm0, %v260_v39, 0.0  ;;  %vm1461_vm8 = vcmask 1045509   ;;  %v333_v2 = vsel %vm262_vm0, %v261_v0, 0.0 }
  0x91   : > { %v478_v48 = vsel %vm1461_vm8, %v427_v36, %v477_v1  ;;  %v327_v49 = vrot.slane %v326_v47, 4  ;;  %v251_v50 = vsel %vm238_vm12, %v1212_v10, 0.0  ;;  %v441_v51 = vadd.f32 %v440_v45, %v439_v37  ;;  %vm1467_vm9 = vmmov %vm1461_vm8 }
  0x92   : > { %v479_v3 = vsel %vm361_vm7, %v434_v40, %v478_v48  ;;  %v321_v52 = vadd.f32 %v320_v46, %v319_v44  ;;  %v334_v53 = vrot.slane %v333_v2, 4  ;;  %v252_v55 = vsel %vm239_vm13, %v1215_v11, 0.0 }
  0x93   : > { %v328_v54 = vadd.f32 %v327_v49, %v326_v47  ;;  %v253_v56 = vsel %vm240_vm14, %v1218_v12, 0.0  ;;  %v254_v57 = vsel %vm241_vm15, %v1221_v13, 0.0  ;;  %v480_v10 = vsel %vm363_vm10, %v441_v51, %v479_v3 }
  0x94   : > { %v322_v59 = vrot.slane %v321_v52, 2  ;;  %v335_v60 = vadd.f32 %v334_v53, %v333_v2  ;;  %v255_v61 = vsel %vm242_vm4, %v1224_v17, 0.0  ;;  %v256_v11 = vsel %vm243_vm11, %v1237_v41, 0.0  ;;  %607 = vadd.xlane.f32.xlu0 %v480_v10 }
  0x95   : > { %v329_v62 = vrot.slane %v328_v54, 2  ;;  %v257_v12 = vsel %vm244_vm6, %v1240_v43, 0.0  ;;  %vm1462_vm1 = vcmp.eq.s32.totalorder %v1252_v6, 7  ;;  %v263_v5 = vsel %vm262_vm0, %v251_v50, 0.0 }
  0x96   : > { %v323_v63 = vadd.f32 %v322_v59, %v321_v52  ;;  %v336_v4 = vrot.slane %v335_v60, 2  ;;  %v258_v13 = vsel %vm1462_vm1, %v1244_v58, 0.0  ;;  %v264_v17 = vrot.slane %v263_v5, 4 }
  0x97   : > { %v330_v7 = vadd.f32 %v329_v62, %v328_v54  ;;  %v270_v8 = vsel %vm262_vm0, %v252_v55, 0.0  ;;  %v277_v9 = vsel %vm262_vm0, %v253_v56, 0.0  ;;  %v284_v19 = vsel %vm262_vm0, %v254_v57, 0.0 }
  0x98   : > { %v324_v41 = vrot.slane %v323_v63, 1  ;;  %v337_v14 = vadd.f32 %v336_v4, %v335_v60  ;;  %v271_v15 = vrot.slane %v270_v8, 4  ;;  %v278_v16 = vrot.slane %v277_v9, 4 }
  0x99   : > { %v331_v43 = vrot.slane %v330_v7, 1  ;;  %v265_v18 = vadd.f32 %v264_v17, %v263_v5  ;;  %v291_v6 = vsel %vm262_vm0, %v255_v61, 0.0  ;;  %v285_v25 = vrot.slane %v284_v19, 4 }
  0x9a   : > { %v325_v58 = vadd.f32 %v324_v41, %v323_v63  ;;  %v338_v20 = vrot.slane %v337_v14, 1  ;;  %v272_v21 = vadd.f32 %v271_v15, %v270_v8  ;;  %v279_v22 = vadd.f32 %v278_v16, %v277_v9 }
  0x9b   : > { %v332_v23 = vadd.f32 %v331_v43, %v330_v7  ;;  %v266_v24 = vrot.slane %v265_v18, 2  ;;  %v292_v26 = vrot.slane %v291_v6, 4  ;;  %v298_v31 = vsel %vm262_vm0, %v256_v11, 0.0 }
  0x9c   : > { %v339_v28 = vadd.f32 %v338_v20, %v337_v14  ;;  %v273_v29 = vrot.slane %v272_v21, 2  ;;  %v280_v30 = vrot.slane %v279_v22, 2  ;;  %vm1463_vm3 = vcmask 1041409  }
  0x9d   : > { %v365_v32 = vsel %vm1463_vm3, %v332_v23, %v325_v58  ;;  %v267_v33 = vadd.f32 %v266_v24, %v265_v18  ;;  %v286_v34 = vadd.f32 %v285_v25, %v284_v19  ;;  %v293_v35 = vadd.f32 %v292_v26, %v291_v6  ;;  %vm1464_vm4 = vmmov %vm1463_vm3 }
  0x9e   : > { %v366_v36 = vsel %vm353_vm2, %v339_v28, %v365_v32  ;;  %v274_v37 = vadd.f32 %v273_v29, %v272_v21  ;;  %v281_v38 = vadd.f32 %v280_v30, %v279_v22  ;;  %v299_v39 = vrot.slane %v298_v31, 4 }
  0x9f   : > { %v370_v40 = vadd.f32 %v366_v36, %v250_v27  ;;  %v268_v42 = vrot.slane %v267_v33, 1  ;;  %v287_v0 = vrot.slane %v286_v34, 2  ;;  %v294_v44 = vrot.slane %v293_v35, 2 }
  0xa0   : > { %v275_v45 = vrot.slane %v274_v37, 1  ;;  %v282_v1 = vrot.slane %v281_v38, 1  ;;  %v300_v46 = vadd.f32 %v299_v39, %v298_v31  ;;  %v305_v47 = vsel %vm262_vm0, %v257_v12, 0.0 }
  0xa1   : > { %372 = vst [vmem:[#allocation2 + $0x8] sm:$0x7] %v370_v40  ;;  %v269_v48 = vadd.f32 %v268_v42, %v267_v33  ;;  %v288_v49 = vadd.f32 %v287_v0, %v286_v34  ;;  %v295_v2 = vadd.f32 %v294_v44, %v293_v35  ;;  %v306_v50 = vrot.slane %v305_v47, 4 }
  0xa2   : > { %v276_v51 = vadd.f32 %v275_v45, %v274_v37  ;;  %v283_v3 = vadd.f32 %v282_v1, %v281_v38  ;;  %v301_v52 = vrot.slane %v300_v46, 2  ;;  %v312_v53 = vsel %vm262_vm0, %v258_v13, 0.0 }
  0xa3   : > { %v289_v54 = vrot.slane %v288_v49, 1  ;;  %v296_v55 = vrot.slane %v295_v2, 1  ;;  %v307_v56 = vadd.f32 %v306_v50, %v305_v47  ;;  %v313_v57 = vrot.slane %v312_v53, 4 }
  0xa4   : > { %v302_v10 = vadd.f32 %v301_v52, %v300_v46  ;;  %v352_v59 = vsel %vm1464_vm4, %v276_v51, %v269_v48  ;;  %vm1465_vm0 = vcmask 1044484   ;;  %vm1466_vm6 = vcmask 1042432  }
  0xa5   : > { %v290_v60 = vadd.f32 %v289_v54, %v288_v49  ;;  %v297_v61 = vadd.f32 %v296_v55, %v295_v2  ;;  %v308_v62 = vrot.slane %v307_v56, 2  ;;  %v314_v11 = vadd.f32 %v313_v57, %v312_v53 }
  0xa6   : > { %v303_v12 = vrot.slane %v302_v10, 1  ;;  %v354_v63 = vsel %vm353_vm2, %v283_v3, %v352_v59  ;;  %v627_v29 = vlaneseq  ;;  %vm636_vm2 = vcmask 2048  }
  0xa7   : > { %v309_v4 = vadd.f32 %v308_v62, %v307_v56  ;;  %v315_v5 = vrot.slane %v314_v11, 2  ;;  %v356_v7 = vsel %vm1458_vm5, %v290_v60, %v354_v63 }
  0xa8   : > { %v598_v17 = vld [vmem:[#allocation2 + $0x8] sm:$0x7]  ;;  %v304_v13 = vadd.f32 %v303_v12, %v302_v10  ;;  %v358_v8 = vsel %vm1465_vm0, %v297_v61, %v356_v7  ;;  %v628_v31 = vshrl.u32 %v627_v29, 7 }
  0xa9   : > { %v602_v9 = vsel %vm1466_vm6, %v598_v17, 0.0  ;;  %v310_v41 = vrot.slane %v309_v4, 1  ;;  %v316_v14 = vadd.f32 %v315_v5, %v314_v11 }
  0xaa   : > { %603 = vadd.xlane.f32.xlu1 %v602_v9  ;;  %v360_v15 = vsel %vm1467_vm9, %v304_v13, %v358_v8 }
  0xab   : > { %v311_v16 = vadd.f32 %v310_v41, %v309_v4  ;;  %v317_v43 = vrot.slane %v316_v14, 1 }
  0xad   : > { %v318_v18 = vadd.f32 %v317_v43, %v316_v14  ;;  %v362_v19 = vsel %vm361_vm7, %v311_v16, %v360_v15  ;;  %vm630_vm7 = vcmp.ge.s32.totalorder %v628_v31, 1 }
  0xaf   : > { %v364_v6 = vsel %vm363_vm10, %v318_v18, %v362_v19  ;;  %vm634_vm10 = vcmask 7168  }
  0xb0   : > { %599 = vadd.xlane.f32.xlu0 %v364_v6 }
 0x103   : > { %v618_v58 = vpop.xlane.xlu1 %617 }
 0x108   : > { %v615_v21 = vpop.xlane.xlu0 %614 }
 0x119   : > { %v611_v20 = vpop.xlane.xlu1 %610 }
 0x11a   : > { %v620_v22 = vadd.f32 %v618_v58, %v611_v20 }
 0x121   : > { %v608_v24 = vpop.xlane.xlu0 %607 }
 0x122   : > { %v619_v26 = vadd.f32 %v615_v21, %v608_v24 }
 0x137   : > { %v604_v23 = vpop.xlane.xlu1 %603 }
 0x138   : > { %v622_v25 = vsub.f32 %v620_v22, %v604_v23 }
 0x13a   : > { %854 = vrcp.f32 %v622_v25 }
 0x13d   : > { %v600_v27 = vpop.xlane.xlu0 %599 }
 0x13e   : > { %v621_v28 = vsub.f32 %v619_v26, %v600_v27 }
 0x140   : > { %856 = vrcp.f32 %v621_v28 }
 0x144   : > { %v855_v30 = vpop.eup %854 }
 0x145   : > { %v626_v32 = vmul.f32 %v855_v30, %v604_v23 }
 0x147   : > { %v637_v35 = vsel %vm636_vm2, %v626_v32, 0.0 }
 0x14a   : > { %v857_v33 = vpop.eup %856 }
 0x14b   : > { %v624_v34 = vmul.f32 %v857_v33, %v600_v27 }
 0x14d   : > { %v632_v36 = vsel %vm630_vm7, %v624_v34, 0.0 }
 0x14e   : > { %v635_v37 = vsel %vm634_vm10, %v632_v36, 0.0 }
 0x14f   : > { %v638_v38 = vadd.f32 %v637_v35, %v635_v37 }
 0x151   : > { %639 = vadd.xlane.f32.xlu0 %v638_v38 }
 0x1de   : > { %v640_v39 = vpop.xlane.xlu0 %639 }
 0x1df   : > { %v641_v40 = vrot.slane %v640_v39, 4 }
 0x1e1   : > { %v642_v42 = vadd.f32 %v641_v40, %v640_v39 }
 0x1e3   : > { %v643_v0 = vrot.slane %v642_v42, 2 }
 0x1e5   : > { %v644_v44 = vadd.f32 %v643_v0, %v642_v42 }
 0x1e7   : > { %v645_v45 = vrot.slane %v644_v44, 1 }
 0x1e9   : > { %v646_v1 = vadd.f32 %v645_v45, %v644_v44 }
 0x1eb   : > { %782 = vpush %v646_v1 }
 0x21c   : > { %s783_s21 = spop %782 }
 0x21d   : > { %s650_s3 = smul.f32 0.1, %s783_s21 }
 0x21f   : > { %s651_s30 = ssub.f32 1.0, %s650_s3 }
 0x221   : > { %v652_v46 = vstv %s651_s30 }
 0x222   : > { %653 = vst [vmem:[%s215_s27] sm:$0x1] %v652_v46 }
 0x223   : > { %931 = shalt.err (!%p928_p9)
}
 0x224   : > { %s932_s18 = scalar_lea.hbm %s1388_s7, 16  ;;  %s936_s15 = scalar_lea.hbm %s1439_s2, 32 }
 0x225   : > { %p933_p1 = scmp.ne.s32.totalorder %s1388_s7, %s932_s18  ;;  %p937_p4 = scmp.lt.u32.totalorder %s1388_s7, %s1439_s2 }
 0x226   : > { %p938_p13 = scmp.lt.u32.totalorder %s936_s15, %s932_s18  ;;  %p940_p0 = scmp.lt.u32.totalorder %s932_s18, %s1388_s7 }
 0x227   : > { %p934_p5 = pnand %p933_p1, %p1468_p3 }
 0x228   : > { %p939_p8 = por %p938_p13, %p937_p4 }
 0x229   : > { %p935_p2 = pneg %p934_p5 }
 0x22a   : > { %p941_p11 = por %p940_p0, %p939_p8 }
 0x22c   : > { %p942_p6 = pnand %p941_p11, %p935_p2 }
 0x22e   : > { %945 = shalt.err (!%p942_p6)
}
 0x22f   : > { %788 = dma.vmem_to_hbm [thread:$0]  (%p1468_p3), %s1390_s29, 16, %s1388_s7, %s655_s8  }
 0x230 PF: > { %s679_s26 = sand.u32 1, %s984_s9   ;;  %p1469_p7 = scmp.ne.s32.totalorder %s1452_s24, 0 }
 0x231   : > { %p1470_p10 = scmp.ge.s32.totalorder %s1004_s14, 2  ;;  %s680_s3 = scalar_lea.sflag [#allocation7], %s679_s26 }
 0x233   : > { %p798_p12 = pnand %p1470_p10, %p1469_p7 }
 0x235   : > { %979 = dma.done.wait (!%p798_p12), %s680_s3, 16  }
 0x236   : > { %981 = vsyncadd (!%p798_p12), %s680_s3, 4294967280  ;;  %s21_s14 = sadd.s32 1, %s1004_s14   ;;  %s1471_s9 = smov %s988_s10 }
 0x237   : > { %p18_p9 = scmp.ge.s32.totalorder %s21_s14, 4   ;;  %s1472_s10 = smov %s992_s11 }
 0x238   : > { %s1473_s11 = smov %s1083_s23  ;;  %s1474_s12 = smov %s1000_s13 }
 0x239   : > { %s1475_s13 = smov %s1477_s17  ;;  %20 = sbr.rel (!%p18_p9) target bundleno = 8 (0x8), region = 94 }
 0x240   :  { %684 = vsyncpa [#allocation6], 1 }
 0x241   :  { %686 = vsyncpa [#allocation6 + $0x1], 1 }
 0x242   :  { %687 = vsyncpa [#allocation9], 1 }
 0x243   :  { %689 = vsyncpa [#allocation9 + $0x1], 1 }
 0x244   :  { %690 = vsyncpa [#allocation7], 1 }
 0x245   :  { %692 = vsyncpa [#allocation7 + $0x1], 1 }

</bundles_post_ra>
